<compile_context>
chip_gen: v7x
topology: tpu7x:2x2x1
jax: 0.10.0
libtpu: 0.0.40
codegen_flags: <defaults>
</compile_context>

<pallas_src>
import numpy as np

import jax
import jax.numpy as jnp
from jax.experimental import pallas as pl
from jax.experimental.pallas import tpu as pltpu

_LANE = 128


def _round_up(x, m):
    return (x + m - 1) // m * m


def pack_params(weights, biases, variable_sizes):
    """Pack per-variable nn.Linear params once (numpy, static) into a compact stack.

    weights: list of (size_i, D) arrays (PyTorch nn.Linear layout)
    biases : list of (size_i,)  arrays
    Returns (w_packed (D, n_cols) bf16, b_packed (1, n_cols) f32,
             segments = ((offset, size), ...), total = sum(sizes)).
    Variables are packed back-to-back; only the tail is lane-padded, and the pad
    columns are never read by the softmax, so no -inf bias masking is needed.
    """
    n_vars = len(variable_sizes)
    assert n_vars > 0 and min(variable_sizes) >= 1
    D = np.asarray(weights[0]).shape[1]
    total = int(sum(variable_sizes))
    n_cols = _round_up(total, _LANE)

    w_np = np.zeros((D, n_cols), np.float32)
    b_np = np.zeros((1, n_cols), np.float32)
    segments = []
    off = 0
    for w, b, vs in zip(weights, biases, variable_sizes):
        w_np[:, off:off + vs] = np.asarray(w, np.float32).T
        b_np[0, off:off + vs] = np.asarray(b, np.float32)
        segments.append((int(off), int(vs)))
        off += int(vs)
    w_packed = jnp.asarray(w_np).astype(jnp.bfloat16)   # MXU-native, half the bytes
    b_packed = jnp.asarray(b_np)                        # f32, added post-accumulate
    return w_packed, b_packed, tuple(segments), total


def _make_kernel(segments):
    """One batch tile: single fused bf16 MXU pass for every variable's logits,
    then an in-place per-variable (compact-segment) softmax into o_ref."""

    def kernel(x_ref, w_ref, b_ref, o_ref):
        # Fused matmul (tm, D) @ (D, n_cols), bf16 operands, f32 accumulate.
        # Logits land directly in the f32 output block (no scratch temporary).
        o_ref[...] = (
            jnp.dot(x_ref[...].astype(jnp.bfloat16), w_ref[...],
                    preferred_element_type=jnp.float32)
            + b_ref[...]
        )
        # Numerically-stable softmax per variable on its compact column segment.
        # Static unroll; total VPU/EUP/XLU work ~ sum(sizes) per row (the lane
        # padding tail is never touched).
        for off, size in segments:
            seg = o_ref[:, off:off + size]
            m = jnp.max(seg, axis=1, keepdims=True)
            e = jnp.exp(seg - m)                   # max column -> exp(0)=1, so s >= 1
            s = jnp.sum(e, axis=1, keepdims=True)
            inv = pl.reciprocal(s, approx=True)    # EUP slot (nearly free)
            inv = inv * (2.0 - s * inv)            # one Newton step -> ~f32 accuracy
            o_ref[:, off:off + size] = e * inv     # normalize in place

    return kernel


def _vmem_budget_bytes():
    """Per-generation VMEM budget (v5e/v6e: 128 MiB physical, v7x: 64 MiB/TC)."""
    cap = None
    try:
        cap = getattr(pltpu.get_tpu_info(), "vmem_capacity_bytes", None)
    except Exception:
        cap = None
    if not cap:
        cap = 64 << 20              # conservative fallback: v7x per-TensorCore size
    budget = int(cap * 0.55)        # for picking the batch tile
    limit = int(cap * 0.70)         # scoped-VMEM limit requested from Mosaic
    return budget, limit


def _pick_batch_tile(B, D, n_cols, budget_bytes):
    """Largest multiple-of-8 batch tile whose footprint fits the budget.

    Footprint (bytes): resident bf16 W (assume double-buffered in case single-
    buffering is unavailable) + bias, plus per batch row: double-buffered f32 x
    and out tiles and ~n_cols f32 of in-kernel softmax temporaries.
    """
    resident = 2 * (D * n_cols * 2) + 2 * (n_cols * 4)
    per_row = 2 * D * 4 + 2 * n_cols * 4 + 2 * n_cols * 4
    avail = max(budget_bytes - resident, 8 * per_row)
    tm = max(8, min(1024, (avail // per_row) // 8 * 8))

    b8 = _round_up(B, 8)
    tm = min(tm, b8)
    # Expose >= 2 batch tiles when possible so dimension_semantics=("parallel",)
    # can split work across both v7x TensorCores.
    if b8 >= 16 and tm >= b8:
        tm = _round_up(b8 // 2, 8)
    return tm


def multi_categorical_forward(inputs, w_packed, b_packed, segments, total):
    """inputs: (B, D) f32. Returns (B, total) f32 (the concat=True branch)."""
    B, D = inputs.shape
    n_cols = w_packed.shape[1]

    budget, vmem_limit = _vmem_budget_bytes()
    tm = _pick_batch_tile(B, D, n_cols, budget)
    b_rows = pl.cdiv(B, tm) * tm
    x = inputs if b_rows == B else jnp.pad(inputs, ((0, b_rows - B), (0, 0)))

    cost = pl.CostEstimate(
        flops=2 * b_rows * D * n_cols,
        transcendentals=b_rows * total,
        bytes_accessed=(4 * b_rows * D + 2 * D * n_cols + 4 * n_cols
                        + 4 * b_rows * n_cols),
    )

    def run(single_buffer_resident):
        def resident_spec(shape):
            if single_buffer_resident:
                return pl.BlockSpec(shape, lambda i: (0, 0),
                                    pipeline_mode=pl.Buffered(1))
            return pl.BlockSpec(shape, lambda i: (0, 0))

        out = pl.pallas_call(
            _make_kernel(segments),
            out_shape=jax.ShapeDtypeStruct((b_rows, n_cols), jnp.float32),
            grid_spec=pltpu.PrefetchScalarGridSpec(
                num_scalar_prefetch=0,
                grid=(b_rows // tm,),
                in_specs=[
                    pl.BlockSpec((tm, D), lambda i: (i, 0)),   # x: tiled over batch
                    resident_spec((D, n_cols)),                # W: resident across tiles
                    resident_spec((1, n_cols)),                # b: resident across tiles
                ],
                out_specs=pl.BlockSpec((tm, n_cols), lambda i: (i, 0)),  # lane-dense
            ),
            compiler_params=pltpu.CompilerParams(
                dimension_semantics=("parallel",),             # megacore split on v7x
                vmem_limit_bytes=vmem_limit,
            ),
            cost_estimate=cost,
        )(x, w_packed, b_packed)
        return jax.block_until_ready(out)

    try:
        padded = run(single_buffer_resident=True)
    except Exception:
        # pl.Buffered(1) not supported by this JAX/Mosaic build -> default pipelining.
        padded = run(single_buffer_resident=False)

    # The kernel output is already the concatenated per-variable softmax layout;
    # only the lane-padding tail / batch padding is trimmed (a plain slice, no
    # gather). Downstream consumers could use `padded` directly and skip this.
    # TODO(synk): for very large D * n_cols on v7x, a second (column) grid axis
    # would cap resident W, but it would require the MXU selection-matrix
    # softmax since variables could straddle column tiles; not needed at
    # compact-packed sizes.
    return padded[:B, :total]


def _reference(inputs, weights, biases):
    outs = []
    for w, b in zip(weights, biases):
        logits = inputs @ w.T + b
        outs.append(jax.nn.softmax(logits, axis=1))
    return jnp.concatenate(outs, axis=1)


if __name__ == "__main__":
    # Small shapes consistent with the module: batch=2, input_size=32,
    # three categorical variables of sizes 3, 4, 5.
    batch = 2
    input_size = 32
    variable_sizes = [3, 4, 5]

    key = jax.random.PRNGKey(0)
    k_x, *k_params = jax.random.split(key, 1 + 2 * len(variable_sizes))

    inputs = jax.random.normal(k_x, (batch, input_size), jnp.float32)

    weights, biases = [], []
    for i, vs in enumerate(variable_sizes):
        kw, kb = k_params[2 * i], k_params[2 * i + 1]
        bound = 1.0 / np.sqrt(np.float32(input_size))  # nn.Linear default init range
        weights.append(jax.random.uniform(kw, (vs, input_size), jnp.float32,
                                          minval=-bound, maxval=bound))
        biases.append(jax.random.uniform(kb, (vs,), jnp.float32,
                                         minval=-bound, maxval=bound))

    # Static, one-time parameter packing (numpy).
    w_packed, b_packed, segments, total = pack_params(weights, biases, variable_sizes)

    out = multi_categorical_forward(inputs, w_packed, b_packed, segments, total)
    out = jax.block_until_ready(out)

    ref = _reference(inputs, weights, biases)
    assert out.shape == (batch, total)
    # bf16 MXU operands (f32 accumulate): compare against the f32 reference with
    # a bf16-level tolerance, and check each variable's probabilities sum to 1.
    assert jnp.allclose(out, ref, atol=2e-2), float(jnp.max(jnp.abs(out - ref)))
    for off, size in segments:
        assert jnp.allclose(out[:, off:off + size].sum(axis=1), 1.0, atol=1e-4)

    # TODO(synk): the non-default branches (gumbel_softmax with temperature,
    # OneHotCategorical sampling at eval time, concat=False list output) are
    # stochastic / alternate-output paths and are not implemented in this
    # deterministic forward kernel.
    print("KERNEL_OK")
</pallas_src>

<mosaic_0001>
module attributes {stable_mosaic.version = 11 : i64} {
  func.func @kernel(%arg0: i32, %arg1: memref<8x32xf32, #tpu.memory_space<vmem>>, %arg2: memref<32x128xbf16, #tpu.memory_space<vmem>>, %arg3: memref<1x128xf32, #tpu.memory_space<vmem>>, %arg4: memref<8x128xf32, #tpu.memory_space<vmem>>) attributes {dimension_semantics = [#tpu.dimension_semantics<parallel>], iteration_bounds = array<i64: 1>, scalar_prefetch = 0 : i64, scratch_operands = 0 : i64, tpu.core_type = #tpu.core_type<tc>, window_params = [{transform_indices = @transform_0, window_bounds = array<i64: 8, 32>}, {pipeline_mode = #tpu.pipeline_mode<synchronous>, transform_indices = @transform_1, window_bounds = array<i64: 32, 128>}, {pipeline_mode = #tpu.pipeline_mode<synchronous>, transform_indices = @transform_2, window_bounds = array<i64: 1, 128>}, {transform_indices = @transform_3, window_bounds = array<i64: 8, 128>}]} {
    %c0 = arith.constant 0 : index
    %c0_0 = arith.constant 0 : index
    %0 = vector.load %arg1[%c0, %c0_0] : memref<8x32xf32, #tpu.memory_space<vmem>>, vector<8x32xf32>
    %1 = arith.truncf %0 : vector<8x32xf32> to vector<8x32xbf16>
    %c0_1 = arith.constant 0 : index
    %c0_2 = arith.constant 0 : index
    %2 = vector.load %arg2[%c0_1, %c0_2] : memref<32x128xbf16, #tpu.memory_space<vmem>>, vector<32x128xbf16>
    %cst = arith.constant dense<0.000000e+00> : vector<8x128xf32>
    %3 = tpu.matmul %1, %2, %cst {dimension_numbers = #tpu.dot_dimension_numbers<[1], [0], [0], [1], [0, 0, 1, 1], [], []>} : vector<8x32xbf16>, vector<32x128xbf16>, vector<8x128xf32> -> vector<8x128xf32>
    %c0_3 = arith.constant 0 : index
    %c0_4 = arith.constant 0 : index
    %4 = vector.load %arg3[%c0_3, %c0_4] : memref<1x128xf32, #tpu.memory_space<vmem>>, vector<1x128xf32>
    %5 = vector.broadcast %4 : vector<1x128xf32> to vector<8x128xf32>
    %6 = arith.addf %3, %5 : vector<8x128xf32>
    %c0_5 = arith.constant 0 : index
    %c0_6 = arith.constant 0 : index
    %7 = vector.load %arg4[%c0_5, %c0_6] : memref<8x128xf32, #tpu.memory_space<vmem>>, vector<8x128xf32>
    tpu.vector_store %arg4[%c0_5, %c0_6], %6 {strides = array<i32>} : memref<8x128xf32, #tpu.memory_space<vmem>>, vector<8x128xf32>,
    %c0_7 = arith.constant 0 : index
    %c0_8 = arith.constant 0 : index
    %8 = vector.load %arg4[%c0_7, %c0_8] : memref<8x128xf32, #tpu.memory_space<vmem>>, vector<8x3xf32>
    %cst_9 = arith.constant dense<0xFF800000> : vector<8xf32>
    %9 = vector.multi_reduction <maximumf>, %8, %cst_9 [1] : vector<8x3xf32> to vector<8xf32>
    %10 = vector.shape_cast %9 : vector<8xf32> to vector<8x1xf32>
    %11 = vector.broadcast %10 : vector<8x1xf32> to vector<8x3xf32>
    %12 = arith.subf %8, %11 : vector<8x3xf32>
    %13 = math.exp %12 : vector<8x3xf32>
    %cst_10 = arith.constant dense<0.000000e+00> : vector<8xf32>
    %14 = vector.multi_reduction <add>, %13, %cst_10 [1] : vector<8x3xf32> to vector<8xf32>
    %15 = vector.shape_cast %14 : vector<8xf32> to vector<8x1xf32>
    %16 = tpu.reciprocal %15 {approx = true} : vector<8x1xf32> -> vector<8x1xf32>
    %17 = arith.mulf %15, %16 : vector<8x1xf32>
    %cst_11 = arith.constant 2.000000e+00 : f32
    %18 = vector.broadcast %cst_11 : f32 to vector<8x1xf32>
    %19 = arith.subf %18, %17 : vector<8x1xf32>
    %20 = arith.mulf %16, %19 : vector<8x1xf32>
    %21 = vector.broadcast %20 : vector<8x1xf32> to vector<8x3xf32>
    %22 = arith.mulf %13, %21 : vector<8x3xf32>
    %c0_12 = arith.constant 0 : index
    %c0_13 = arith.constant 0 : index
    %23 = vector.load %arg4[%c0_12, %c0_13] : memref<8x128xf32, #tpu.memory_space<vmem>>, vector<8x3xf32>
    tpu.vector_store %arg4[%c0_12, %c0_13], %22 {strides = array<i32>} : memref<8x128xf32, #tpu.memory_space<vmem>>, vector<8x3xf32>,
    %c0_14 = arith.constant 0 : index
    %c3 = arith.constant 3 : index
    %24 = vector.load %arg4[%c0_14, %c3] : memref<8x128xf32, #tpu.memory_space<vmem>>, vector<8x4xf32>
    %cst_15 = arith.constant dense<0xFF800000> : vector<8xf32>
    %25 = vector.multi_reduction <maximumf>, %24, %cst_15 [1] : vector<8x4xf32> to vector<8xf32>
    %26 = vector.shape_cast %25 : vector<8xf32> to vector<8x1xf32>
    %27 = vector.broadcast %26 : vector<8x1xf32> to vector<8x4xf32>
    %28 = arith.subf %24, %27 : vector<8x4xf32>
    %29 = math.exp %28 : vector<8x4xf32>
    %cst_16 = arith.constant dense<0.000000e+00> : vector<8xf32>
    %30 = vector.multi_reduction <add>, %29, %cst_16 [1] : vector<8x4xf32> to vector<8xf32>
    %31 = vector.shape_cast %30 : vector<8xf32> to vector<8x1xf32>
    %32 = tpu.reciprocal %31 {approx = true} : vector<8x1xf32> -> vector<8x1xf32>
    %33 = arith.mulf %31, %32 : vector<8x1xf32>
    %cst_17 = arith.constant 2.000000e+00 : f32
    %34 = vector.broadcast %cst_17 : f32 to vector<8x1xf32>
    %35 = arith.subf %34, %33 : vector<8x1xf32>
    %36 = arith.mulf %32, %35 : vector<8x1xf32>
    %37 = vector.broadcast %36 : vector<8x1xf32> to vector<8x4xf32>
    %38 = arith.mulf %29, %37 : vector<8x4xf32>
    %c0_18 = arith.constant 0 : index
    %c3_19 = arith.constant 3 : index
    %39 = vector.load %arg4[%c0_18, %c3_19] : memref<8x128xf32, #tpu.memory_space<vmem>>, vector<8x4xf32>
    tpu.vector_store %arg4[%c0_18, %c3_19], %38 {strides = array<i32>} : memref<8x128xf32, #tpu.memory_space<vmem>>, vector<8x4xf32>,
    %c0_20 = arith.constant 0 : index
    %c7 = arith.constant 7 : index
    %40 = vector.load %arg4[%c0_20, %c7] : memref<8x128xf32, #tpu.memory_space<vmem>>, vector<8x5xf32>
    %cst_21 = arith.constant dense<0xFF800000> : vector<8xf32>
    %41 = vector.multi_reduction <maximumf>, %40, %cst_21 [1] : vector<8x5xf32> to vector<8xf32>
    %42 = vector.shape_cast %41 : vector<8xf32> to vector<8x1xf32>
    %43 = vector.broadcast %42 : vector<8x1xf32> to vector<8x5xf32>
    %44 = arith.subf %40, %43 : vector<8x5xf32>
    %45 = math.exp %44 : vector<8x5xf32>
    %cst_22 = arith.constant dense<0.000000e+00> : vector<8xf32>
    %46 = vector.multi_reduction <add>, %45, %cst_22 [1] : vector<8x5xf32> to vector<8xf32>
    %47 = vector.shape_cast %46 : vector<8xf32> to vector<8x1xf32>
    %48 = tpu.reciprocal %47 {approx = true} : vector<8x1xf32> -> vector<8x1xf32>
    %49 = arith.mulf %47, %48 : vector<8x1xf32>
    %cst_23 = arith.constant 2.000000e+00 : f32
    %50 = vector.broadcast %cst_23 : f32 to vector<8x1xf32>
    %51 = arith.subf %50, %49 : vector<8x1xf32>
    %52 = arith.mulf %48, %51 : vector<8x1xf32>
    %53 = vector.broadcast %52 : vector<8x1xf32> to vector<8x5xf32>
    %54 = arith.mulf %45, %53 : vector<8x5xf32>
    %c0_24 = arith.constant 0 : index
    %c7_25 = arith.constant 7 : index
    %55 = vector.load %arg4[%c0_24, %c7_25] : memref<8x128xf32, #tpu.memory_space<vmem>>, vector<8x5xf32>
    tpu.vector_store %arg4[%c0_24, %c7_25], %54 {strides = array<i32>} : memref<8x128xf32, #tpu.memory_space<vmem>>, vector<8x5xf32>,
    return
  }
  func.func @transform_0(%arg0: i32) -> (i32, i32) {
    %c0_i32 = arith.constant 0 : i32
    %c0_i32_0 = arith.constant 0 : i32
    return %arg0, %c0_i32 : i32, i32
  }
  func.func @transform_1(%arg0: i32) -> (i32, i32) {
    %c0_i32 = arith.constant 0 : i32
    %c0_i32_0 = arith.constant 0 : i32
    %c0_i32_1 = arith.constant 0 : i32
    return %c0_i32, %c0_i32_0 : i32, i32
  }
  func.func @transform_2(%arg0: i32) -> (i32, i32) {
    %c0_i32 = arith.constant 0 : i32
    %c0_i32_0 = arith.constant 0 : i32
    %c0_i32_1 = arith.constant 0 : i32
    return %c0_i32, %c0_i32_0 : i32, i32
  }
  func.func @transform_3(%arg0: i32) -> (i32, i32) {
    %c0_i32 = arith.constant 0 : i32
    %c0_i32_0 = arith.constant 0 : i32
    return %arg0, %c0_i32 : i32, i32
  }
}

module attributes {stable_mosaic.version = 11 : i64} {
  func.func @kernel(%arg0: i32, %arg1: memref<8x32xf32, #tpu.memory_space<vmem>>, %arg2: memref<32x128xbf16, #tpu.memory_space<vmem>>, %arg3: memref<1x128xf32, #tpu.memory_space<vmem>>, %arg4: memref<8x128xf32, #tpu.memory_space<vmem>>) attributes {dimension_semantics = [#tpu.dimension_semantics<parallel>], iteration_bounds = array<i64: 1>, scalar_prefetch = 0 : i64, scratch_operands = 0 : i64, tpu.core_type = #tpu.core_type<tc>, window_params = [{transform_indices = @transform_0, window_bounds = array<i64: 8, 32>}, {pipeline_mode = #tpu.pipeline_mode<synchronous>, transform_indices = @transform_1, window_bounds = array<i64: 32, 128>}, {pipeline_mode = #tpu.pipeline_mode<synchronous>, transform_indices = @transform_2, window_bounds = array<i64: 1, 128>}, {transform_indices = @transform_3, window_bounds = array<i64: 8, 128>}]} {
    %c0 = arith.constant 0 : index
    %c0_0 = arith.constant 0 : index
    %0 = vector.load %arg1[%c0, %c0_0] : memref<8x32xf32, #tpu.memory_space<vmem>>, vector<8x32xf32>
    %1 = arith.truncf %0 : vector<8x32xf32> to vector<8x32xbf16>
    %c0_1 = arith.constant 0 : index
    %c0_2 = arith.constant 0 : index
    %2 = vector.load %arg2[%c0_1, %c0_2] : memref<32x128xbf16, #tpu.memory_space<vmem>>, vector<32x128xbf16>
    %cst = arith.constant dense<0.000000e+00> : vector<8x128xf32>
    %3 = tpu.matmul %1, %2, %cst {dimension_numbers = #tpu.dot_dimension_numbers<[1], [0], [0], [1], [0, 0, 1, 1], [], []>} : vector<8x32xbf16>, vector<32x128xbf16>, vector<8x128xf32> -> vector<8x128xf32>
    %c0_3 = arith.constant 0 : index
    %c0_4 = arith.constant 0 : index
    %4 = vector.load %arg3[%c0_3, %c0_4] : memref<1x128xf32, #tpu.memory_space<vmem>>, vector<1x128xf32>
    %5 = vector.broadcast %4 : vector<1x128xf32> to vector<8x128xf32>
    %6 = arith.addf %3, %5 : vector<8x128xf32>
    %c0_5 = arith.constant 0 : index
    %c0_6 = arith.constant 0 : index
    %7 = vector.load %arg4[%c0_5, %c0_6] : memref<8x128xf32, #tpu.memory_space<vmem>>, vector<8x128xf32>
    tpu.vector_store %arg4[%c0_5, %c0_6], %6 {strides = array<i32>} : memref<8x128xf32, #tpu.memory_space<vmem>>, vector<8x128xf32>,
    %c0_7 = arith.constant 0 : index
    %c0_8 = arith.constant 0 : index
    %8 = vector.load %arg4[%c0_7, %c0_8] : memref<8x128xf32, #tpu.memory_space<vmem>>, vector<8x3xf32>
    %cst_9 = arith.constant dense<0xFF800000> : vector<8xf32>
    %9 = vector.multi_reduction <maximumf>, %8, %cst_9 [1] : vector<8x3xf32> to vector<8xf32>
    %10 = vector.shape_cast %9 : vector<8xf32> to vector<8x1xf32>
    %11 = vector.broadcast %10 : vector<8x1xf32> to vector<8x3xf32>
    %12 = arith.subf %8, %11 : vector<8x3xf32>
    %13 = math.exp %12 : vector<8x3xf32>
    %cst_10 = arith.constant dense<0.000000e+00> : vector<8xf32>
    %14 = vector.multi_reduction <add>, %13, %cst_10 [1] : vector<8x3xf32> to vector<8xf32>
    %15 = vector.shape_cast %14 : vector<8xf32> to vector<8x1xf32>
    %16 = tpu.reciprocal %15 {approx = true} : vector<8x1xf32> -> vector<8x1xf32>
    %17 = arith.mulf %15, %16 : vector<8x1xf32>
    %cst_11 = arith.constant 2.000000e+00 : f32
    %18 = vector.broadcast %cst_11 : f32 to vector<8x1xf32>
    %19 = arith.subf %18, %17 : vector<8x1xf32>
    %20 = arith.mulf %16, %19 : vector<8x1xf32>
    %21 = vector.broadcast %20 : vector<8x1xf32> to vector<8x3xf32>
    %22 = arith.mulf %13, %21 : vector<8x3xf32>
    %c0_12 = arith.constant 0 : index
    %c0_13 = arith.constant 0 : index
    %23 = vector.load %arg4[%c0_12, %c0_13] : memref<8x128xf32, #tpu.memory_space<vmem>>, vector<8x3xf32>
    tpu.vector_store %arg4[%c0_12, %c0_13], %22 {strides = array<i32>} : memref<8x128xf32, #tpu.memory_space<vmem>>, vector<8x3xf32>,
    %c0_14 = arith.constant 0 : index
    %c3 = arith.constant 3 : index
    %24 = vector.load %arg4[%c0_14, %c3] : memref<8x128xf32, #tpu.memory_space<vmem>>, vector<8x4xf32>
    %cst_15 = arith.constant dense<0xFF800000> : vector<8xf32>
    %25 = vector.multi_reduction <maximumf>, %24, %cst_15 [1] : vector<8x4xf32> to vector<8xf32>
    %26 = vector.shape_cast %25 : vector<8xf32> to vector<8x1xf32>
    %27 = vector.broadcast %26 : vector<8x1xf32> to vector<8x4xf32>
    %28 = arith.subf %24, %27 : vector<8x4xf32>
    %29 = math.exp %28 : vector<8x4xf32>
    %cst_16 = arith.constant dense<0.000000e+00> : vector<8xf32>
    %30 = vector.multi_reduction <add>, %29, %cst_16 [1] : vector<8x4xf32> to vector<8xf32>
    %31 = vector.shape_cast %30 : vector<8xf32> to vector<8x1xf32>
    %32 = tpu.reciprocal %31 {approx = true} : vector<8x1xf32> -> vector<8x1xf32>
    %33 = arith.mulf %31, %32 : vector<8x1xf32>
    %cst_17 = arith.constant 2.000000e+00 : f32
    %34 = vector.broadcast %cst_17 : f32 to vector<8x1xf32>
    %35 = arith.subf %34, %33 : vector<8x1xf32>
    %36 = arith.mulf %32, %35 : vector<8x1xf32>
    %37 = vector.broadcast %36 : vector<8x1xf32> to vector<8x4xf32>
    %38 = arith.mulf %29, %37 : vector<8x4xf32>
    %c0_18 = arith.constant 0 : index
    %c3_19 = arith.constant 3 : index
    %39 = vector.load %arg4[%c0_18, %c3_19] : memref<8x128xf32, #tpu.memory_space<vmem>>, vector<8x4xf32>
    tpu.vector_store %arg4[%c0_18, %c3_19], %38 {strides = array<i32>} : memref<8x128xf32, #tpu.memory_space<vmem>>, vector<8x4xf32>,
    %c0_20 = arith.constant 0 : index
    %c7 = arith.constant 7 : index
    %40 = vector.load %arg4[%c0_20, %c7] : memref<8x128xf32, #tpu.memory_space<vmem>>, vector<8x5xf32>
    %cst_21 = arith.constant dense<0xFF800000> : vector<8xf32>
    %41 = vector.multi_reduction <maximumf>, %40, %cst_21 [1] : vector<8x5xf32> to vector<8xf32>
    %42 = vector.shape_cast %41 : vector<8xf32> to vector<8x1xf32>
    %43 = vector.broadcast %42 : vector<8x1xf32> to vector<8x5xf32>
    %44 = arith.subf %40, %43 : vector<8x5xf32>
    %45 = math.exp %44 : vector<8x5xf32>
    %cst_22 = arith.constant dense<0.000000e+00> : vector<8xf32>
    %46 = vector.multi_reduction <add>, %45, %cst_22 [1] : vector<8x5xf32> to vector<8xf32>
    %47 = vector.shape_cast %46 : vector<8xf32> to vector<8x1xf32>
    %48 = tpu.reciprocal %47 {approx = true} : vector<8x1xf32> -> vector<8x1xf32>
    %49 = arith.mulf %47, %48 : vector<8x1xf32>
    %cst_23 = arith.constant 2.000000e+00 : f32
    %50 = vector.broadcast %cst_23 : f32 to vector<8x1xf32>
    %51 = arith.subf %50, %49 : vector<8x1xf32>
    %52 = arith.mulf %48, %51 : vector<8x1xf32>
    %53 = vector.broadcast %52 : vector<8x1xf32> to vector<8x5xf32>
    %54 = arith.mulf %45, %53 : vector<8x5xf32>
    %c0_24 = arith.constant 0 : index
    %c7_25 = arith.constant 7 : index
    %55 = vector.load %arg4[%c0_24, %c7_25] : memref<8x128xf32, #tpu.memory_space<vmem>>, vector<8x5xf32>
    tpu.vector_store %arg4[%c0_24, %c7_25], %54 {strides = array<i32>} : memref<8x128xf32, #tpu.memory_space<vmem>>, vector<8x5xf32>,
    return
  }
  func.func @transform_0(%arg0: i32) -> (i32, i32) {
    %c0_i32 = arith.constant 0 : i32
    %c0_i32_0 = arith.constant 0 : i32
    return %arg0, %c0_i32 : i32, i32
  }
  func.func @transform_1(%arg0: i32) -> (i32, i32) {
    %c0_i32 = arith.constant 0 : i32
    %c0_i32_0 = arith.constant 0 : i32
    %c0_i32_1 = arith.constant 0 : i32
    return %c0_i32, %c0_i32_0 : i32, i32
  }
  func.func @transform_2(%arg0: i32) -> (i32, i32) {
    %c0_i32 = arith.constant 0 : i32
    %c0_i32_0 = arith.constant 0 : i32
    %c0_i32_1 = arith.constant 0 : i32
    return %c0_i32, %c0_i32_0 : i32, i32
  }
  func.func @transform_3(%arg0: i32) -> (i32, i32) {
    %c0_i32 = arith.constant 0 : i32
    %c0_i32_0 = arith.constant 0 : i32
    return %arg0, %c0_i32 : i32, i32
  }
}

</mosaic_0001>

<bundles_post_ra>
// kernel: tpu_custom_call.1
= control target key start
LH: loop header
LB: loop body
LE: loop exit
PB: predicated region body
PF: predicated region fallthrough
CT: control target
= control target key end

     0   :  { %8 = vsyncpa [#allocation3], 0  ;;  %s381_s0 = inlined_call_operand.hbm [shape: f32[8,32], index: 0, kind: input, shape index: {}]   ;;  %s382_s1 = inlined_call_operand.hbm [shape: bf16[32,128], index: 1, kind: input, shape index: {}]   ;;  %s383_s2 = inlined_call_operand.vmem [shape: f32[1,128], index: 2, kind: input, shape index: {}]   ;;  %s384_s3 = inlined_call_operand.hbm [shape: f32[8,128], index: 3, kind: output, shape index: {}]  }
   0x1   :  { %9 = vsyncpa [#allocation6], 0 }
   0x2   :  { %10 = vsyncpa [#allocation4], 0  ;;  %s299_s12 = smov [#allocation2]   ;;  %s300_s14 = smov [#allocation5]  }
   0x3   :  { %s17_s13 = sshll.u32 %s299_s12, 4  ;;  %s26_s15 = sshll.u32 %s300_s14, 4  ;;  %s18_s13 = int_to_ptr.vmem [resolvable:$true] %s17_s13  ;;  %s328_s15 = int_to_ptr.vmem [resolvable:$true] %s26_s15 }
   0x4   :  { %s227_s18 = scalar_lea.hbm %s381_s0, 128 }
   0x5   :  { %p228_p0 = scmp.ne.s32.totalorder %s381_s0, %s227_s18  ;;  %p231_p1 = scmp.lt.u32.totalorder %s227_s18, %s381_s0 }
   0x7   :  { %p233_p2 = pnand %p231_p1, %p228_p0 }
   0x9   :  { %236 = shalt.err (!%p233_p2)
}
   0xa   :  { %s237_s23 = scalar_lea.vmem %s18_s13, 128  ;;  %p242_p4 = scmp.lt.s32.totalorder %s18_s13, %s18_s13 }
   0xb   :  { %p238_p3 = scmp.ne.s32.totalorder %s18_s13, %s237_s23  ;;  %p243_p5 = scmp.lt.s32.totalorder %s237_s23, %s237_s23 }
   0xd   :  { %p244_p6 = por %p243_p5, %p242_p4 }
   0xf   :  { %p245_p7 = pnand %p244_p6, %p238_p3 }
  0x11   :  { %248 = shalt.err (!%p245_p7)
}
  0x12   :  { %20 = dma.hbm_to_vmem [thread:$0]  %s381_s0, 128, %s18_s13, [#allocation3]  }
  0x13   :  { %s249_s28 = scalar_lea.hbm %s382_s1, 256 }
  0x14   :  { %p250_p8 = scmp.ne.s32.totalorder %s382_s1, %s249_s28  ;;  %p253_p9 = scmp.lt.u32.totalorder %s249_s28, %s382_s1 }
  0x16   :  { %p255_p10 = pnand %p253_p9, %p250_p8 }
  0x18   :  { %258 = shalt.err (!%p255_p10)
}
  0x19   :  { %s259_s6 = scalar_lea.vmem %s328_s15, 256  ;;  %p264_p12 = scmp.lt.s32.totalorder %s328_s15, %s328_s15 }
  0x1a   :  { %p260_p11 = scmp.ne.s32.totalorder %s328_s15, %s259_s6  ;;  %p265_p13 = scmp.lt.s32.totalorder %s259_s6, %s259_s6 }
  0x1c   :  { %p266_p0 = por %p265_p13, %p264_p12 }
  0x1e   :  { %p267_p1 = pnand %p266_p0, %p260_p11 }
  0x20   :  { %270 = shalt.err (!%p267_p1)
}
  0x21   :  { %s301_s0 = smov 64   ;;  %s302_s7 = smov 4  }
  0x22   :  { %32 = dma.hbm_to_vmem [thread:$0]  %s382_s1, 256, %s328_s15, [#allocation6], %s301_s0, %s301_s0, %s302_s7  }
  0x23   :  { %293 = dma.done.wait [#allocation3], 128  }
  0x24   :  { %294 = vsyncadd [#allocation3], 4294967168 }
  0x25   :  { %295 = dma.done.wait [#allocation6], 256  }
  0x26   :  { %296 = vsyncadd [#allocation6], 4294967040  ;;  %v303_v0 = vmov 0.0   ;;  %vm304_vm0 = vmmov 0   ;;  %v213_v1 = vld [vmem:[#allocation5] sm:$0xff]   ;;  %v214_v2 = vld [vmem:[#allocation5 + $0x8] sm:$0xff]  }
  0x27   :  { %196 = vmatprep.subr.bf16.mxu0 %v303_v0  ;;  %200 = vmatprep.mubr.msk.bf16.mxu0 %vm304_vm0, %v303_v0  ;;  %v42_v3 = vld [vmem:[#allocation2] sm:$0xff]  ;;  %vm67_vm1 = vcmask 261120   ;;  %vm113_vm2 = vcmask 23552   ;;  %vm130_vm3 = vcmask 56344   ;;  %s305_s1 = smov 125   ;;  %vm141_vm4 = vcmask 31744  }
  0x28   :  { %197 = vmatpush3.bf16.msra.mxu0 %v213_v1  ;;  %v43_v4 = vpack.c.bf16 %v42_v3, %v42_v3  ;;  %v189_v5 = vld [vmem:[%s383_s2] ss:$0 sm:$0xff]  ;;  %vm152_vm5 = vcmask 97336   ;;  %s306_s2 = smov 121   ;;  %vm163_vm6 = vcmask 39936   ;;  %s307_s12 = smov [#allocation7]  }
  0x29   :  { %198 = vmatprep.subr.bf16.mxu0 %v303_v0  ;;  %s179_s13 = sshll.u32 %s307_s12, 4  ;;  %s180_s13 = int_to_ptr.vmem [resolvable:$true] %s179_s13 }
  0x2a   :  { %s271_s14 = scalar_lea.vmem %s180_s13, 128  ;;  %p276_p3 = scmp.lt.s32.totalorder %s180_s13, %s180_s13 }
  0x2b   :  { %p272_p2 = scmp.ne.s32.totalorder %s180_s13, %s271_s14  ;;  %p277_p4 = scmp.lt.s32.totalorder %s271_s14, %s271_s14 }
  0x2c   :  { %199 = vmatpush3.bf16.msra.mxu0 %v214_v2 }
  0x2d   :  { %p278_p5 = por %p277_p4, %p276_p3 }
  0x2f   :  { %201 = vmatmul.mubr.msk.bf16.vlgmr.msra.gmra.mrb[0].mxu0 %vm67_vm1, %v43_v4  ;;  %p279_p6 = pnand %p278_p5, %p272_p2 }
 0x102   :  { %v105_v6 = vpop.f32.mrb[0].mxu0 }
 0x103   :  { %v106_v7 = vadd.f32 %v189_v5, %v105_v6  ;;  %v202_v8 = vpop.f32.mrb[1].mxu0 }
 0x104   :  { %v108_v9 = vpop.f32.mrb[2].mxu0 }
 0x105   :  { %111 = vst [vmem:[#allocation7] sm:$0xff] %v106_v7  ;;  %v203_v10 = vpop.f32.mrb[3].mxu0  ;;  %v114_v11 = vsel %vm113_vm2, %v106_v7, -inf }
 0x106   :  { %115 = vmax.xlane.f32.xlu0 %v114_v11 }
 0x193   :  { %v116_v12 = vpop.xlane.xlu0 %115 }
 0x194   :  { %v117_v13 = vsub.f32 %v106_v7, %v116_v12 }
 0x196   :  { %v118_v14 = vmul.f32 1.442695, %v117_v13 }
 0x198   :  { %215 = vpow2.f32 %v118_v14 }
 0x1a2   :  { %v216_v15 = vpop.eup %215 }
 0x1a3   :  { %v120_v16 = vsel %vm113_vm2, %v216_v15, 0.0 }
 0x1a4   :  { %121 = vadd.xlane.f32.xlu0 %v120_v16 }
 0x231   :  { %v122_v17 = vpop.xlane.xlu0 %121 }
 0x232   :  { %217 = vrcp.f32 %v122_v17 }
 0x23c   :  { %v218_v18 = vpop.eup %217 }
 0x23d   :  { %v124_v19 = vmul.f32 %v218_v18, %v122_v17 }
 0x23f   :  { %v125_v20 = vsub.f32 2.0, %v124_v19 }
 0x241   :  { %v126_v21 = vmul.f32 %v218_v18, %v125_v20 }
 0x243   :  { %v127_v22 = vmul.f32 %v216_v15, %v126_v21 }
 0x245   :  { %128 = vst.msk [vmem:[#allocation7] sm:$0xff] %vm113_vm2, %v127_v22 }
 0x24c   :  { %v129_v23 = vld [vmem:[#allocation7] sm:$0xff] }
 0x24d   :  { %v131_v24 = vsel %vm130_vm3, %v129_v23, -inf }
 0x24e   :  { %132 = vmax.xlane.f32.xlu1 %v131_v24 }
 0x2db   :  { %v133_v25 = vpop.xlane.xlu1 %132 }
 0x2dc   :  { %v134_v26 = vsub.f32 %v129_v23, %v133_v25 }
 0x2de   :  { %v135_v27 = vmul.f32 1.442695, %v134_v26 }
 0x2e0   :  { %219 = vpow2.f32 %v135_v27 }
 0x2ea   :  { %v220_v28 = vpop.eup %219 }
 0x2eb   :  { %138 = vrot.lane.b32.xlu1 %v220_v28, %s305_s1 }
 0x35d   :  { %v139_v29 = vpop.permute.xlu1 %138 }
 0x35e   :  { %v142_v30 = vsel %vm141_vm4, %v139_v29, 0.0 }
 0x35f   :  { %143 = vadd.xlane.f32.xlu0 %v142_v30 }
 0x3ec   :  { %v144_v31 = vpop.xlane.xlu0 %143 }
 0x3ed   :  { %221 = vrcp.f32 %v144_v31 }
 0x3f7   :  { %v222_v32 = vpop.eup %221 }
 0x3f8   :  { %v146_v33 = vmul.f32 %v222_v32, %v144_v31 }
 0x3fa   :  { %v147_v34 = vsub.f32 2.0, %v146_v33 }
 0x3fc   :  { %v148_v35 = vmul.f32 %v222_v32, %v147_v34 }
 0x3fe   :  { %v149_v36 = vmul.f32 %v220_v28, %v148_v35 }
 0x400   :  { %150 = vst.msk [vmem:[#allocation7] sm:$0xff] %vm130_vm3, %v149_v36 }
 0x407   :  { %v151_v37 = vld [vmem:[#allocation7] sm:$0xff] }
 0x408   :  { %v153_v38 = vsel %vm152_vm5, %v151_v37, -inf }
 0x409   :  { %154 = vmax.xlane.f32.xlu0 %v153_v38 }
 0x496   :  { %v155_v39 = vpop.xlane.xlu0 %154 }
 0x497   :  { %v156_v40 = vsub.f32 %v151_v37, %v155_v39 }
 0x499   :  { %v157_v41 = vmul.f32 1.442695, %v156_v40 }
 0x49b   :  { %223 = vpow2.f32 %v157_v41 }
 0x4a5   :  { %v224_v42 = vpop.eup %223 }
 0x4a6   :  { %160 = vrot.lane.b32.xlu0 %v224_v42, %s306_s2 }
 0x518   :  { %v161_v43 = vpop.permute.xlu0 %160 }
 0x519   :  { %v164_v44 = vsel %vm163_vm6, %v161_v43, 0.0 }
 0x51a   :  { %165 = vadd.xlane.f32.xlu1 %v164_v44 }
 0x5a7   :  { %v166_v45 = vpop.xlane.xlu1 %165 }
 0x5a8   :  { %225 = vrcp.f32 %v166_v45 }
 0x5b2   :  { %v226_v46 = vpop.eup %225 }
 0x5b3   :  { %v168_v47 = vmul.f32 %v226_v46, %v166_v45 }
 0x5b5   :  { %v169_v48 = vsub.f32 2.0, %v168_v47 }
 0x5b7   :  { %v170_v49 = vmul.f32 %v226_v46, %v169_v48 }
 0x5b9   :  { %v171_v50 = vmul.f32 %v224_v42, %v170_v49 }
 0x5bb   :  { %172 = vst.msk [vmem:[#allocation7] sm:$0xff] %vm152_vm5, %v171_v50 }
 0x5bc   :  { %282 = shalt.err (!%p279_p6)
}
 0x5bd   :  { %s283_s17 = scalar_lea.hbm %s384_s3, 128 }
 0x5be   :  { %p284_p7 = scmp.ne.s32.totalorder %s384_s3, %s283_s17  ;;  %p287_p8 = scmp.lt.u32.totalorder %s283_s17, %s384_s3 }
 0x5c0   :  { %p289_p9 = pnand %p287_p8, %p284_p7 }
 0x5c2   :  { %292 = shalt.err (!%p289_p9)
}
 0x5c3   :  { %182 = dma.vmem_to_hbm [thread:$0]  %s180_s13, 128, %s384_s3, [#allocation4]  }
 0x5c4   :  { %297 = dma.done.wait [#allocation4], 128  }
 0x5c5   :  { %298 = vsyncadd [#allocation4], 4294967168 }
 0x5c6   :  { %186 = vsyncpa [#allocation3], 1 }
 0x5c7   :  { %187 = vsyncpa [#allocation6], 1 }
 0x5c8   :  { %188 = vsyncpa [#allocation4], 1 }

// kernel: tpu_custom_call.1
= control target key start
LH: loop header
LB: loop body
LE: loop exit
PB: predicated region body
PF: predicated region fallthrough
CT: control target
= control target key end

     0   :  { %8 = vsyncpa [#allocation3], 0  ;;  %s381_s0 = inlined_call_operand.hbm [shape: f32[8,32], index: 0, kind: input, shape index: {}]   ;;  %s382_s1 = inlined_call_operand.hbm [shape: bf16[32,128], index: 1, kind: input, shape index: {}]   ;;  %s383_s2 = inlined_call_operand.vmem [shape: f32[1,128], index: 2, kind: input, shape index: {}]   ;;  %s384_s3 = inlined_call_operand.hbm [shape: f32[8,128], index: 3, kind: output, shape index: {}]  }
   0x1   :  { %9 = vsyncpa [#allocation6], 0 }
   0x2   :  { %10 = vsyncpa [#allocation4], 0  ;;  %s299_s12 = smov [#allocation2]   ;;  %s300_s14 = smov [#allocation5]  }
   0x3   :  { %s17_s13 = sshll.u32 %s299_s12, 4  ;;  %s26_s15 = sshll.u32 %s300_s14, 4  ;;  %s18_s13 = int_to_ptr.vmem [resolvable:$true] %s17_s13  ;;  %s328_s15 = int_to_ptr.vmem [resolvable:$true] %s26_s15 }
   0x4   :  { %s227_s18 = scalar_lea.hbm %s381_s0, 128 }
   0x5   :  { %p228_p0 = scmp.ne.s32.totalorder %s381_s0, %s227_s18  ;;  %p231_p1 = scmp.lt.u32.totalorder %s227_s18, %s381_s0 }
   0x7   :  { %p233_p2 = pnand %p231_p1, %p228_p0 }
   0x9   :  { %236 = shalt.err (!%p233_p2)
}
   0xa   :  { %s237_s23 = scalar_lea.vmem %s18_s13, 128  ;;  %p242_p4 = scmp.lt.s32.totalorder %s18_s13, %s18_s13 }
   0xb   :  { %p238_p3 = scmp.ne.s32.totalorder %s18_s13, %s237_s23  ;;  %p243_p5 = scmp.lt.s32.totalorder %s237_s23, %s237_s23 }
   0xd   :  { %p244_p6 = por %p243_p5, %p242_p4 }
   0xf   :  { %p245_p7 = pnand %p244_p6, %p238_p3 }
  0x11   :  { %248 = shalt.err (!%p245_p7)
}
  0x12   :  { %20 = dma.hbm_to_vmem [thread:$0]  %s381_s0, 128, %s18_s13, [#allocation3]  }
  0x13   :  { %s249_s28 = scalar_lea.hbm %s382_s1, 256 }
  0x14   :  { %p250_p8 = scmp.ne.s32.totalorder %s382_s1, %s249_s28  ;;  %p253_p9 = scmp.lt.u32.totalorder %s249_s28, %s382_s1 }
  0x16   :  { %p255_p10 = pnand %p253_p9, %p250_p8 }
  0x18   :  { %258 = shalt.err (!%p255_p10)
}
  0x19   :  { %s259_s6 = scalar_lea.vmem %s328_s15, 256  ;;  %p264_p12 = scmp.lt.s32.totalorder %s328_s15, %s328_s15 }
  0x1a   :  { %p260_p11 = scmp.ne.s32.totalorder %s328_s15, %s259_s6  ;;  %p265_p13 = scmp.lt.s32.totalorder %s259_s6, %s259_s6 }
  0x1c   :  { %p266_p0 = por %p265_p13, %p264_p12 }
  0x1e   :  { %p267_p1 = pnand %p266_p0, %p260_p11 }
  0x20   :  { %270 = shalt.err (!%p267_p1)
}
  0x21   :  { %s301_s0 = smov 64   ;;  %s302_s7 = smov 4  }
  0x22   :  { %32 = dma.hbm_to_vmem [thread:$0]  %s382_s1, 256, %s328_s15, [#allocation6], %s301_s0, %s301_s0, %s302_s7  }
  0x23   :  { %293 = dma.done.wait [#allocation3], 128  }
  0x24   :  { %294 = vsyncadd [#allocation3], 4294967168 }
  0x25   :  { %295 = dma.done.wait [#allocation6], 256  }
  0x26   :  { %296 = vsyncadd [#allocation6], 4294967040  ;;  %v303_v0 = vmov 0.0   ;;  %vm304_vm0 = vmmov 0   ;;  %v213_v1 = vld [vmem:[#allocation5] sm:$0xff]   ;;  %v214_v2 = vld [vmem:[#allocation5 + $0x8] sm:$0xff]  }
  0x27   :  { %196 = vmatprep.subr.bf16.mxu0 %v303_v0  ;;  %200 = vmatprep.mubr.msk.bf16.mxu0 %vm304_vm0, %v303_v0  ;;  %v42_v3 = vld [vmem:[#allocation2] sm:$0xff]  ;;  %vm67_vm1 = vcmask 261120   ;;  %vm113_vm2 = vcmask 23552   ;;  %vm130_vm3 = vcmask 56344   ;;  %s305_s1 = smov 125   ;;  %vm141_vm4 = vcmask 31744  }
  0x28   :  { %197 = vmatpush3.bf16.msra.mxu0 %v213_v1  ;;  %v43_v4 = vpack.c.bf16 %v42_v3, %v42_v3  ;;  %v189_v5 = vld [vmem:[%s383_s2] ss:$0 sm:$0xff]  ;;  %vm152_vm5 = vcmask 97336   ;;  %s306_s2 = smov 121   ;;  %vm163_vm6 = vcmask 39936   ;;  %s307_s12 = smov [#allocation7]  }
  0x29   :  { %198 = vmatprep.subr.bf16.mxu0 %v303_v0  ;;  %s179_s13 = sshll.u32 %s307_s12, 4  ;;  %s180_s13 = int_to_ptr.vmem [resolvable:$true] %s179_s13 }
  0x2a   :  { %s271_s14 = scalar_lea.vmem %s180_s13, 128  ;;  %p276_p3 = scmp.lt.s32.totalorder %s180_s13, %s180_s13 }
  0x2b   :  { %p272_p2 = scmp.ne.s32.totalorder %s180_s13, %s271_s14  ;;  %p277_p4 = scmp.lt.s32.totalorder %s271_s14, %s271_s14 }
  0x2c   :  { %199 = vmatpush3.bf16.msra.mxu0 %v214_v2 }
  0x2d   :  { %p278_p5 = por %p277_p4, %p276_p3 }
  0x2f   :  { %201 = vmatmul.mubr.msk.bf16.vlgmr.msra.gmra.mrb[0].mxu0 %vm67_vm1, %v43_v4  ;;  %p279_p6 = pnand %p278_p5, %p272_p2 }
 0x102   :  { %v105_v6 = vpop.f32.mrb[0].mxu0 }
 0x103   :  { %v106_v7 = vadd.f32 %v189_v5, %v105_v6  ;;  %v202_v8 = vpop.f32.mrb[1].mxu0 }
 0x104   :  { %v108_v9 = vpop.f32.mrb[2].mxu0 }
 0x105   :  { %111 = vst [vmem:[#allocation7] sm:$0xff] %v106_v7  ;;  %v203_v10 = vpop.f32.mrb[3].mxu0  ;;  %v114_v11 = vsel %vm113_vm2, %v106_v7, -inf }
 0x106   :  { %115 = vmax.xlane.f32.xlu0 %v114_v11 }
 0x193   :  { %v116_v12 = vpop.xlane.xlu0 %115 }
 0x194   :  { %v117_v13 = vsub.f32 %v106_v7, %v116_v12 }
 0x196   :  { %v118_v14 = vmul.f32 1.442695, %v117_v13 }
 0x198   :  { %215 = vpow2.f32 %v118_v14 }
 0x1a2   :  { %v216_v15 = vpop.eup %215 }
 0x1a3   :  { %v120_v16 = vsel %vm113_vm2, %v216_v15, 0.0 }
 0x1a4   :  { %121 = vadd.xlane.f32.xlu0 %v120_v16 }
 0x231   :  { %v122_v17 = vpop.xlane.xlu0 %121 }
 0x232   :  { %217 = vrcp.f32 %v122_v17 }
 0x23c   :  { %v218_v18 = vpop.eup %217 }
 0x23d   :  { %v124_v19 = vmul.f32 %v218_v18, %v122_v17 }
 0x23f   :  { %v125_v20 = vsub.f32 2.0, %v124_v19 }
 0x241   :  { %v126_v21 = vmul.f32 %v218_v18, %v125_v20 }
 0x243   :  { %v127_v22 = vmul.f32 %v216_v15, %v126_v21 }
 0x245   :  { %128 = vst.msk [vmem:[#allocation7] sm:$0xff] %vm113_vm2, %v127_v22 }
 0x24c   :  { %v129_v23 = vld [vmem:[#allocation7] sm:$0xff] }
 0x24d   :  { %v131_v24 = vsel %vm130_vm3, %v129_v23, -inf }
 0x24e   :  { %132 = vmax.xlane.f32.xlu1 %v131_v24 }
 0x2db   :  { %v133_v25 = vpop.xlane.xlu1 %132 }
 0x2dc   :  { %v134_v26 = vsub.f32 %v129_v23, %v133_v25 }
 0x2de   :  { %v135_v27 = vmul.f32 1.442695, %v134_v26 }
 0x2e0   :  { %219 = vpow2.f32 %v135_v27 }
 0x2ea   :  { %v220_v28 = vpop.eup %219 }
 0x2eb   :  { %138 = vrot.lane.b32.xlu1 %v220_v28, %s305_s1 }
 0x35d   :  { %v139_v29 = vpop.permute.xlu1 %138 }
 0x35e   :  { %v142_v30 = vsel %vm141_vm4, %v139_v29, 0.0 }
 0x35f   :  { %143 = vadd.xlane.f32.xlu0 %v142_v30 }
 0x3ec   :  { %v144_v31 = vpop.xlane.xlu0 %143 }
 0x3ed   :  { %221 = vrcp.f32 %v144_v31 }
 0x3f7   :  { %v222_v32 = vpop.eup %221 }
 0x3f8   :  { %v146_v33 = vmul.f32 %v222_v32, %v144_v31 }
 0x3fa   :  { %v147_v34 = vsub.f32 2.0, %v146_v33 }
 0x3fc   :  { %v148_v35 = vmul.f32 %v222_v32, %v147_v34 }
 0x3fe   :  { %v149_v36 = vmul.f32 %v220_v28, %v148_v35 }
 0x400   :  { %150 = vst.msk [vmem:[#allocation7] sm:$0xff] %vm130_vm3, %v149_v36 }
 0x407   :  { %v151_v37 = vld [vmem:[#allocation7] sm:$0xff] }
 0x408   :  { %v153_v38 = vsel %vm152_vm5, %v151_v37, -inf }
 0x409   :  { %154 = vmax.xlane.f32.xlu0 %v153_v38 }
 0x496   :  { %v155_v39 = vpop.xlane.xlu0 %154 }
 0x497   :  { %v156_v40 = vsub.f32 %v151_v37, %v155_v39 }
 0x499   :  { %v157_v41 = vmul.f32 1.442695, %v156_v40 }
 0x49b   :  { %223 = vpow2.f32 %v157_v41 }
 0x4a5   :  { %v224_v42 = vpop.eup %223 }
 0x4a6   :  { %160 = vrot.lane.b32.xlu0 %v224_v42, %s306_s2 }
 0x518   :  { %v161_v43 = vpop.permute.xlu0 %160 }
 0x519   :  { %v164_v44 = vsel %vm163_vm6, %v161_v43, 0.0 }
 0x51a   :  { %165 = vadd.xlane.f32.xlu1 %v164_v44 }
 0x5a7   :  { %v166_v45 = vpop.xlane.xlu1 %165 }
 0x5a8   :  { %225 = vrcp.f32 %v166_v45 }
 0x5b2   :  { %v226_v46 = vpop.eup %225 }
 0x5b3   :  { %v168_v47 = vmul.f32 %v226_v46, %v166_v45 }
 0x5b5   :  { %v169_v48 = vsub.f32 2.0, %v168_v47 }
 0x5b7   :  { %v170_v49 = vmul.f32 %v226_v46, %v169_v48 }
 0x5b9   :  { %v171_v50 = vmul.f32 %v224_v42, %v170_v49 }
 0x5bb   :  { %172 = vst.msk [vmem:[#allocation7] sm:$0xff] %vm152_vm5, %v171_v50 }
 0x5bc   :  { %282 = shalt.err (!%p279_p6)
}
 0x5bd   :  { %s283_s17 = scalar_lea.hbm %s384_s3, 128 }
 0x5be   :  { %p284_p7 = scmp.ne.s32.totalorder %s384_s3, %s283_s17  ;;  %p287_p8 = scmp.lt.u32.totalorder %s283_s17, %s384_s3 }
 0x5c0   :  { %p289_p9 = pnand %p287_p8, %p284_p7 }
 0x5c2   :  { %292 = shalt.err (!%p289_p9)
}
 0x5c3   :  { %182 = dma.vmem_to_hbm [thread:$0]  %s180_s13, 128, %s384_s3, [#allocation4]  }
 0x5c4   :  { %297 = dma.done.wait [#allocation4], 128  }
 0x5c5   :  { %298 = vsyncadd [#allocation4], 4294967168 }
 0x5c6   :  { %186 = vsyncpa [#allocation3], 1 }
 0x5c7   :  { %187 = vsyncpa [#allocation6], 1 }
 0x5c8   :  { %188 = vsyncpa [#allocation4], 1 }

</bundles_post_ra>
